<compile_context>
chip_gen: v5e
topology: v5e:2x2
jax: 0.10.0
libtpu: 0.0.40
codegen_flags: <defaults>
</compile_context>

<pallas_src>
import jax
import jax.numpy as jnp
from jax.experimental import pallas as pl
from jax.experimental.pallas import tpu as pltpu

LANE = 128      # TPU lane width: pad weight output dims to a multiple of this
SUBLANE = 8     # f32 sublane granularity for the batch tile


def mlp_kernel(x_ref, w1_ref, b1_ref, w2_ref, b2_ref, w3_ref, b3_ref, o_ref):
    # fc1 + relu  (bf16 operands on the MXU, f32 accumulate; cast x in-kernel)
    x = x_ref[...].astype(jnp.bfloat16)
    h1 = jnp.dot(x, w1_ref[...], preferred_element_type=jnp.float32)
    h1 = jnp.maximum(h1 + b1_ref[...], 0.0)
    # fc2 + relu
    h2 = jnp.dot(h1.astype(jnp.bfloat16), w2_ref[...],
                 preferred_element_type=jnp.float32)
    h2 = jnp.maximum(h2 + b2_ref[...], 0.0)
    # fc3 (no activation)
    y = jnp.dot(h2.astype(jnp.bfloat16), w3_ref[...],
                preferred_element_type=jnp.float32)
    o_ref[...] = (y + b3_ref[...]).astype(o_ref.dtype)


def _pad_to(a, shape):
    return jnp.pad(a, [(0, t - s) for s, t in zip(a.shape, shape)])


def _round_up(n, m):
    return pl.cdiv(n, m) * m


def prepare_params(w1, b1, w2, b2, w3, b3):
    """One-time parameter prep: zero-pad output/lane dims to 128 and cast
    weights to bf16 (MXU-native).  Contracting dim of w1 stays unpadded so x
    can be passed to the kernel without padding."""
    in_size, h1_size = w1.shape
    h2_size = w2.shape[1]
    out_size = w3.shape[1]

    h1_p = _round_up(h1_size, LANE)
    h2_p = _round_up(h2_size, LANE)
    out_p = _round_up(out_size, LANE)

    return {
        "w1": _pad_to(w1, (in_size, h1_p)).astype(jnp.bfloat16),
        "w2": _pad_to(w2, (h1_p, h2_p)).astype(jnp.bfloat16),
        "w3": _pad_to(w3, (h2_p, out_p)).astype(jnp.bfloat16),
        "b1": _pad_to(b1.reshape(1, -1), (1, h1_p)).astype(jnp.float32),
        "b2": _pad_to(b2.reshape(1, -1), (1, h2_p)).astype(jnp.float32),
        "b3": _pad_to(b3.reshape(1, -1), (1, out_p)).astype(jnp.float32),
        "out_size": out_size,   # python int, used only for the final slice
    }


def simple_nn_forward(x, params, *, max_tb=2048):
    """x: (B, in_size) float32. Returns (B, out_size) in x.dtype."""
    # NOTE: for tiny batches (B < ~1-2K) a plain XLA 3-GEMM fusion is just as
    # fast; this kernel is aimed at large-batch inference but is exact for all B.
    B, in_size = x.shape
    w1p, b1p = params["w1"], params["b1"]
    w2p, b2p = params["w2"], params["b2"]
    w3p, b3p = params["w3"], params["b3"]
    out_size = params["out_size"]
    out_p = w3p.shape[1]
    assert w1p.shape[0] == in_size

    # Batch tile: multiple of 8 sublanes, capped so large batches produce
    # >= 4 grid steps (v7x 2-TC sharding + DMA pipelining), small batches 1.
    TB = max(SUBLANE, min(max_tb, _round_up(pl.cdiv(B, 4), SUBLANE)))
    grid = (pl.cdiv(B, TB),)

    # Resident-weight specs: same (0, 0) block every grid step (stay in VMEM).
    def resident(a):
        return pl.BlockSpec(a.shape, lambda i: (0, 0))

    flops = 2 * B * (in_size * w1p.shape[1]
                     + w2p.shape[0] * w2p.shape[1]
                     + w3p.shape[0] * out_p)
    bytes_accessed = (
        x.size * x.dtype.itemsize
        + (w1p.size + w2p.size + w3p.size) * 2
        + (b1p.size + b2p.size + b3p.size) * 4
        + B * out_p * x.dtype.itemsize
    )

    out_padded = pl.pallas_call(
        mlp_kernel,
        out_shape=jax.ShapeDtypeStruct((B, out_p), x.dtype),
        grid=grid,
        in_specs=[
            pl.BlockSpec((TB, in_size), lambda i: (i, 0)),   # x: tiled over batch
            resident(w1p), resident(b1p),
            resident(w2p), resident(b2p),
            resident(w3p), resident(b3p),
        ],
        out_specs=pl.BlockSpec((TB, out_p), lambda i: (i, 0)),
        compiler_params=pltpu.CompilerParams(
            dimension_semantics=("parallel",),   # batch sharded on v7x's 2 TCs
        ),
        cost_estimate=pl.CostEstimate(
            flops=flops, transcendentals=0, bytes_accessed=bytes_accessed),
    )(x, w1p, b1p, w2p, b2p, w3p, b3p)

    # Lane-padded columns are exactly zero-padded; slice back to logical width.
    return out_padded[:, :out_size]


def init_linear(key, fan_in, fan_out):
    # Matches PyTorch nn.Linear default init: U(-1/sqrt(fan_in), 1/sqrt(fan_in)).
    # Weight returned as (in, out) == nn.Linear.weight.T
    kw, kb = jax.random.split(key)
    bound = 1.0 / jnp.sqrt(fan_in)
    w = jax.random.uniform(kw, (fan_in, fan_out), jnp.float32, -bound, bound)
    b = jax.random.uniform(kb, (fan_out,), jnp.float32, -bound, bound)
    return w, b


if __name__ == "__main__":
    input_size, hidden_size1, hidden_size2, output_size = 32, 64, 48, 16
    batch = 8

    key = jax.random.PRNGKey(0)
    kx, k1, k2, k3 = jax.random.split(key, 4)

    x = jax.random.normal(kx, (batch, input_size), jnp.float32)
    w1, b1 = init_linear(k1, input_size, hidden_size1)
    w2, b2 = init_linear(k2, hidden_size1, hidden_size2)
    w3, b3 = init_linear(k3, hidden_size2, output_size)

    # One-time parameter preparation (hoisted out of the forward path).
    params = prepare_params(w1, b1, w2, b2, w3, b3)
    params = jax.tree_util.tree_map(
        lambda a: jax.block_until_ready(a) if isinstance(a, jax.Array) else a,
        params)

    out = simple_nn_forward(x, params)
    out = jax.block_until_ready(out)

    # Pure-JAX reference using the same bf16-operand / f32-accumulate recipe.
    ref = jnp.maximum(
        jnp.dot(x.astype(jnp.bfloat16), w1.astype(jnp.bfloat16),
                preferred_element_type=jnp.float32) + b1[None, :], 0.0)
    ref = jnp.maximum(
        jnp.dot(ref.astype(jnp.bfloat16), w2.astype(jnp.bfloat16),
                preferred_element_type=jnp.float32) + b2[None, :], 0.0)
    ref = jnp.dot(ref.astype(jnp.bfloat16), w3.astype(jnp.bfloat16),
                  preferred_element_type=jnp.float32) + b3[None, :]

    assert out.shape == (batch, output_size), out.shape
    assert out.dtype == x.dtype, out.dtype
    assert jnp.allclose(out, ref, atol=2e-3, rtol=2e-3), (
        float(jnp.max(jnp.abs(out - ref))))

    print("KERNEL_OK")
</pallas_src>

<mosaic_0001>
module attributes {stable_mosaic.version = 11 : i64} {
  func.func @mlp_kernel(%arg0: i32, %arg1: memref<8x32xf32, #tpu.memory_space<vmem>>, %arg2: memref<32x128xbf16, #tpu.memory_space<vmem>>, %arg3: memref<1x128xf32, #tpu.memory_space<vmem>>, %arg4: memref<128x128xbf16, #tpu.memory_space<vmem>>, %arg5: memref<1x128xf32, #tpu.memory_space<vmem>>, %arg6: memref<128x128xbf16, #tpu.memory_space<vmem>>, %arg7: memref<1x128xf32, #tpu.memory_space<vmem>>, %arg8: memref<8x128xf32, #tpu.memory_space<vmem>>) attributes {dimension_semantics = [#tpu.dimension_semantics<parallel>], iteration_bounds = array<i64: 1>, scalar_prefetch = 0 : i64, scratch_operands = 0 : i64, tpu.core_type = #tpu.core_type<tc>, window_params = [{transform_indices = @transform_0, window_bounds = array<i64: 8, 32>}, {pipeline_mode = #tpu.pipeline_mode<synchronous>, transform_indices = @transform_1, window_bounds = array<i64: 32, 128>}, {pipeline_mode = #tpu.pipeline_mode<synchronous>, transform_indices = @transform_2, window_bounds = array<i64: 1, 128>}, {pipeline_mode = #tpu.pipeline_mode<synchronous>, transform_indices = @transform_3, window_bounds = array<i64: 128, 128>}, {pipeline_mode = #tpu.pipeline_mode<synchronous>, transform_indices = @transform_4, window_bounds = array<i64: 1, 128>}, {pipeline_mode = #tpu.pipeline_mode<synchronous>, transform_indices = @transform_5, window_bounds = array<i64: 128, 128>}, {pipeline_mode = #tpu.pipeline_mode<synchronous>, transform_indices = @transform_6, window_bounds = array<i64: 1, 128>}, {transform_indices = @transform_7, window_bounds = array<i64: 8, 128>}]} {
    %c0 = arith.constant 0 : index
    %c0_0 = arith.constant 0 : index
    %0 = vector.load %arg1[%c0, %c0_0] : memref<8x32xf32, #tpu.memory_space<vmem>>, vector<8x32xf32>
    %1 = arith.truncf %0 : vector<8x32xf32> to vector<8x32xbf16>
    %c0_1 = arith.constant 0 : index
    %c0_2 = arith.constant 0 : index
    %2 = vector.load %arg2[%c0_1, %c0_2] : memref<32x128xbf16, #tpu.memory_space<vmem>>, vector<32x128xbf16>
    %cst = arith.constant dense<0.000000e+00> : vector<8x128xf32>
    %3 = tpu.matmul %1, %2, %cst {dimension_numbers = #tpu.dot_dimension_numbers<[1], [0], [0], [1], [0, 0, 1, 1], [], []>} : vector<8x32xbf16>, vector<32x128xbf16>, vector<8x128xf32> -> vector<8x128xf32>
    %c0_3 = arith.constant 0 : index
    %c0_4 = arith.constant 0 : index
    %4 = vector.load %arg3[%c0_3, %c0_4] : memref<1x128xf32, #tpu.memory_space<vmem>>, vector<1x128xf32>
    %5 = vector.broadcast %4 : vector<1x128xf32> to vector<8x128xf32>
    %6 = arith.addf %3, %5 : vector<8x128xf32>
    %cst_5 = arith.constant 0.000000e+00 : f32
    %7 = vector.broadcast %cst_5 : f32 to vector<8x128xf32>
    %8 = arith.maximumf %6, %7 : vector<8x128xf32>
    %9 = arith.truncf %8 : vector<8x128xf32> to vector<8x128xbf16>
    %c0_6 = arith.constant 0 : index
    %c0_7 = arith.constant 0 : index
    %10 = vector.load %arg4[%c0_6, %c0_7] : memref<128x128xbf16, #tpu.memory_space<vmem>>, vector<128x128xbf16>
    %cst_8 = arith.constant dense<0.000000e+00> : vector<8x128xf32>
    %11 = tpu.matmul %9, %10, %cst_8 {dimension_numbers = #tpu.dot_dimension_numbers<[1], [0], [0], [1], [0, 0, 1, 1], [], []>} : vector<8x128xbf16>, vector<128x128xbf16>, vector<8x128xf32> -> vector<8x128xf32>
    %c0_9 = arith.constant 0 : index
    %c0_10 = arith.constant 0 : index
    %12 = vector.load %arg5[%c0_9, %c0_10] : memref<1x128xf32, #tpu.memory_space<vmem>>, vector<1x128xf32>
    %13 = vector.broadcast %12 : vector<1x128xf32> to vector<8x128xf32>
    %14 = arith.addf %11, %13 : vector<8x128xf32>
    %cst_11 = arith.constant 0.000000e+00 : f32
    %15 = vector.broadcast %cst_11 : f32 to vector<8x128xf32>
    %16 = arith.maximumf %14, %15 : vector<8x128xf32>
    %17 = arith.truncf %16 : vector<8x128xf32> to vector<8x128xbf16>
    %c0_12 = arith.constant 0 : index
    %c0_13 = arith.constant 0 : index
    %18 = vector.load %arg6[%c0_12, %c0_13] : memref<128x128xbf16, #tpu.memory_space<vmem>>, vector<128x128xbf16>
    %cst_14 = arith.constant dense<0.000000e+00> : vector<8x128xf32>
    %19 = tpu.matmul %17, %18, %cst_14 {dimension_numbers = #tpu.dot_dimension_numbers<[1], [0], [0], [1], [0, 0, 1, 1], [], []>} : vector<8x128xbf16>, vector<128x128xbf16>, vector<8x128xf32> -> vector<8x128xf32>
    %c0_15 = arith.constant 0 : index
    %c0_16 = arith.constant 0 : index
    %20 = vector.load %arg7[%c0_15, %c0_16] : memref<1x128xf32, #tpu.memory_space<vmem>>, vector<1x128xf32>
    %21 = vector.broadcast %20 : vector<1x128xf32> to vector<8x128xf32>
    %22 = arith.addf %19, %21 : vector<8x128xf32>
    %c0_17 = arith.constant 0 : index
    %c0_18 = arith.constant 0 : index
    %23 = vector.load %arg8[%c0_17, %c0_18] : memref<8x128xf32, #tpu.memory_space<vmem>>, vector<8x128xf32>
    tpu.vector_store %arg8[%c0_17, %c0_18], %22 {strides = array<i32>} : memref<8x128xf32, #tpu.memory_space<vmem>>, vector<8x128xf32>,
    return
  }
  func.func @transform_0(%arg0: i32) -> (i32, i32) {
    %c0_i32 = arith.constant 0 : i32
    %c0_i32_0 = arith.constant 0 : i32
    return %arg0, %c0_i32 : i32, i32
  }
  func.func @transform_1(%arg0: i32) -> (i32, i32) {
    %c0_i32 = arith.constant 0 : i32
    %c0_i32_0 = arith.constant 0 : i32
    %c0_i32_1 = arith.constant 0 : i32
    return %c0_i32, %c0_i32_0 : i32, i32
  }
  func.func @transform_2(%arg0: i32) -> (i32, i32) {
    %c0_i32 = arith.constant 0 : i32
    %c0_i32_0 = arith.constant 0 : i32
    %c0_i32_1 = arith.constant 0 : i32
    return %c0_i32, %c0_i32_0 : i32, i32
  }
  func.func @transform_3(%arg0: i32) -> (i32, i32) {
    %c0_i32 = arith.constant 0 : i32
    %c0_i32_0 = arith.constant 0 : i32
    %c0_i32_1 = arith.constant 0 : i32
    return %c0_i32, %c0_i32_0 : i32, i32
  }
  func.func @transform_4(%arg0: i32) -> (i32, i32) {
    %c0_i32 = arith.constant 0 : i32
    %c0_i32_0 = arith.constant 0 : i32
    %c0_i32_1 = arith.constant 0 : i32
    return %c0_i32, %c0_i32_0 : i32, i32
  }
  func.func @transform_5(%arg0: i32) -> (i32, i32) {
    %c0_i32 = arith.constant 0 : i32
    %c0_i32_0 = arith.constant 0 : i32
    %c0_i32_1 = arith.constant 0 : i32
    return %c0_i32, %c0_i32_0 : i32, i32
  }
  func.func @transform_6(%arg0: i32) -> (i32, i32) {
    %c0_i32 = arith.constant 0 : i32
    %c0_i32_0 = arith.constant 0 : i32
    %c0_i32_1 = arith.constant 0 : i32
    return %c0_i32, %c0_i32_0 : i32, i32
  }
  func.func @transform_7(%arg0: i32) -> (i32, i32) {
    %c0_i32 = arith.constant 0 : i32
    %c0_i32_0 = arith.constant 0 : i32
    return %arg0, %c0_i32 : i32, i32
  }
}

</mosaic_0001>

<bundles_post_ra>
// kernel: tpu_custom_call.1
= control target key start
LH: loop header
LB: loop body
LE: loop exit
PB: predicated region body
PF: predicated region fallthrough
CT: control target
= control target key end

     0   :  { %12 = vsyncpa [#allocation3], 0  ;;  %s614_s0 = inlined_call_operand.hbm [shape: f32[8,32], index: 0, kind: input, shape index: {}]   ;;  %s615_s1 = inlined_call_operand.hbm [shape: bf16[32,128], index: 1, kind: input, shape index: {}]   ;;  %s616_s2 = inlined_call_operand.vmem [shape: f32[1,128], index: 2, kind: input, shape index: {}]   ;;  %s617_s3 = inlined_call_operand.hbm [shape: bf16[128,128], index: 3, kind: input, shape index: {}]   ;;  %s618_s4 = inlined_call_operand.vmem [shape: f32[1,128], index: 4, kind: input, shape index: {}]   ;;  %s619_s5 = inlined_call_operand.hbm [shape: bf16[128,128], index: 5, kind: input, shape index: {}]   ;;  %s620_s6 = inlined_call_operand.vmem [shape: f32[1,128], index: 6, kind: input, shape index: {}]   ;;  %s621_s7 = inlined_call_operand.hbm [shape: f32[8,128], index: 7, kind: output, shape index: {}]  }
   0x1   :  { %13 = vsyncpa [#allocation6], 0 }
   0x2   :  { %14 = vsyncpa [#allocation9], 0  ;;  %s31_s26 = sshll.u32 %s615_s1, 4  ;;  %s32_s26 = int_to_ptr.hbm [resolvable:$true] %s31_s26 }
   0x3   :  { %15 = vsyncpa [#allocation4], 0  ;;  %s543_s27 = smov [#allocation5]   ;;  %s21_s8 = sshll.u32 %s614_s0, 4  ;;  %s22_s8 = int_to_ptr.hbm [resolvable:$true] %s21_s8 }
   0x4   :  { %s33_s28 = sshll.u32 %s543_s27, 4  ;;  %s544_s9 = smov 64   ;;  %s34_s28 = int_to_ptr.vmem [resolvable:$true] %s33_s28 }
   0x5   :  { %s545_s10 = smov 4   ;;  %s546_s11 = smov [#allocation2]  }
   0x6   :  { %39 = dma.hbm_to_vmem [thread:$0]  %s32_s26, 256, %s34_s28, [#allocation6], %s544_s9, %s544_s9, %s545_s10  }
   0x7   :  { %s23_s12 = sshll.u32 %s546_s11, 4  ;;  %s46_s15 = sshll.u32 %s617_s3, 4  ;;  %s24_s12 = int_to_ptr.vmem [resolvable:$true] %s23_s12  ;;  %s47_s15 = int_to_ptr.hbm [resolvable:$true] %s46_s15 }
   0x8   :  { %26 = dma.hbm_to_vmem [thread:$0]  %s22_s8, 128, %s24_s12, [#allocation3]  }
   0x9   :  { %s61_s17 = sshll.u32 %s619_s5, 4  ;;  %s547_s18 = smov [#allocation7]   ;;  %s62_s17 = int_to_ptr.hbm [resolvable:$true] %s61_s17 }
   0xa   :  { %s48_s19 = sshll.u32 %s547_s18, 4  ;;  %s548_s0 = smov [#allocation8]   ;;  %s49_s19 = int_to_ptr.vmem [resolvable:$true] %s48_s19 }
   0xb   :  { %54 = dma.hbm_to_vmem [thread:$0]  %s47_s15, 1024, %s49_s19, [#allocation6], %s544_s9, %s544_s9, %s545_s10  }
   0xc   :  { %s63_s20 = sshll.u32 %s548_s0, 4  ;;  %s64_s20 = int_to_ptr.vmem [resolvable:$true] %s63_s20 }
   0xd   :  { %69 = dma.hbm_to_vmem [thread:$0]  %s62_s17, 1024, %s64_s20, [#allocation9], %s544_s9, %s544_s9, %s545_s10  }
   0xe   :  { %535 = dma.done.wait [#allocation3], 128  }
   0xf   :  { %536 = vsyncadd [#allocation3], 4294967168 }
  0x10   :  { %537 = dma.done.wait [#allocation6], 1280  }
  0x11   :  { %538 = vsyncadd [#allocation6], 4294966016 }
  0x12   :  { %539 = dma.done.wait [#allocation9], 1024  }
  0x13   :  { %540 = vsyncadd [#allocation9], 4294966272  ;;  %v388_v0 = vld [vmem:[#allocation5 + $0x8] sm:$0xff]  ;;  %v387_v2 = vld [vmem:[#allocation5] sm:$0xff]  ;;  %vm111_vm0 = vcmask 261120   ;;  %s549_s24 = smov [#allocation10]  }
  0x14   :  { %v396_v1 = vld [vmem:[#allocation7 + $0x38] sm:$0xff]  ;;  %121 = vmatpush.bf16.msra.mxu0 %v388_v0  ;;  %v89_v3 = vld [vmem:[#allocation2] sm:$0xff]  ;;  %v395_v4 = vld [vmem:[#allocation7 + $0x30] sm:$0xff]  ;;  %s300_s25 = sshll.u32 %s549_s24, 4  ;;  %s302_s28 = sshll.u32 %s621_s7, 4  ;;  %s301_s25 = int_to_ptr.vmem [resolvable:$true] %s300_s25  ;;  %s303_s28 = int_to_ptr.hbm [resolvable:$true] %s302_s28 }
  0x15   :  { %198 = vmatpush.bf16.msra.mxu1 %v396_v1  ;;  %v90_v5 = vpack.c.bf16 %v89_v3, %v89_v3  ;;  %v394_v6 = vld [vmem:[#allocation7 + $0x28] sm:$0xff]  ;;  %v393_v7 = vld [vmem:[#allocation7 + $0x20] sm:$0xff]  ;;  %v392_v8 = vld [vmem:[#allocation7 + $0x18] sm:$0xff] }
  0x16   :  { %v391_v9 = vld [vmem:[#allocation7 + $0x10] sm:$0xff]  ;;  %v390_v10 = vld [vmem:[#allocation7 + $0x8] sm:$0xff]  ;;  %v389_v11 = vld [vmem:[#allocation7] sm:$0xff] }
  0x17   :  { %v404_v12 = vld [vmem:[#allocation8 + $0x38] sm:$0xff]  ;;  %v403_v13 = vld [vmem:[#allocation8 + $0x30] sm:$0xff]  ;;  %v402_v14 = vld [vmem:[#allocation8 + $0x28] sm:$0xff] }
  0x18   :  { %122 = vmatpush.bf16.msra.mxu0 %v387_v2  ;;  %281 = vmatpush.bf16.msra.mxu2 %v404_v12  ;;  %v401_v15 = vld [vmem:[#allocation8 + $0x20] sm:$0xff]  ;;  %v400_v16 = vld [vmem:[#allocation8 + $0x18] sm:$0xff]  ;;  %v399_v17 = vld [vmem:[#allocation8 + $0x10] sm:$0xff] }
  0x19   :  { %199 = vmatpush.bf16.msra.mxu1 %v395_v4  ;;  %v412_v18 = vld [vmem:[%s616_s2] ss:$0 sm:$0xff]  ;;  %v397_v25 = vld [vmem:[#allocation8] sm:$0xff] }
  0x1a   :  { %v398_v24 = vld [vmem:[#allocation8 + $0x8] sm:$0xff] }
  0x1b   :  { %322 = vmatmul.msk.bf16.vlgmr.msra.gmra.mxu0 %vm111_vm0, %v90_v5  ;;  %v413_v26 = vld [vmem:[%s618_s4] ss:$0 sm:$0xff] }
  0x1c   :  { %282 = vmatpush.bf16.msra.mxu2 %v403_v13  ;;  %v414_v32 = vld [vmem:[%s620_s6] ss:$0 sm:$0xff] }
  0x1d   :  { %200 = vmatpush.bf16.msra.mxu1 %v394_v6 }
  0x20   :  { %283 = vmatpush.bf16.msra.mxu2 %v402_v14 }
  0x21   :  { %201 = vmatpush.bf16.msra.mxu1 %v393_v7 }
  0x24   :  { %284 = vmatpush.bf16.msra.mxu2 %v401_v15 }
  0x25   :  { %202 = vmatpush.bf16.msra.mxu1 %v392_v8 }
  0x28   :  { %285 = vmatpush.bf16.msra.mxu2 %v400_v16 }
  0x29   :  { %203 = vmatpush.bf16.msra.mxu1 %v391_v9 }
  0x2c   :  { %286 = vmatpush.bf16.msra.mxu2 %v399_v17 }
  0x2d   :  { %204 = vmatpush.bf16.msra.mxu1 %v390_v10 }
  0x30   :  { %287 = vmatpush.bf16.msra.mxu2 %v398_v24 }
  0x31   :  { %205 = vmatpush.bf16.msra.mxu1 %v389_v11 }
  0x34   :  { %288 = vmatpush.bf16.msra.mxu2 %v397_v25 }
  0x98   :  { %v124_v19 = vpop.f32.mrf.mxu0 }
  0x99   :  { %v125_v20 = vadd.f32 %v412_v18, %v124_v19 }
  0x9b   :  { %v128_v21 = vmax.f32 %v125_v20, 0.0 }
  0x9d   :  { %v129_v22 = vpack.c.bf16 %v128_v21, %v128_v21 }
  0x9f   :  { %206 = vmatmul.bf16.vlgmr.msra.gmra.mxu1 %v129_v22 }
  0xa0   :  { %v126_v23 = vpop.f32.mrf.mxu0 }
 0x11c   :  { %v207_v27 = vpop.f32.mrf.mxu1 }
 0x11d   :  { %v208_v28 = vadd.f32 %v413_v26, %v207_v27 }
 0x11f   :  { %v211_v29 = vmax.f32 %v208_v28, 0.0 }
 0x121   :  { %v212_v30 = vpack.c.bf16 %v211_v29, %v211_v29 }
 0x123   :  { %289 = vmatmul.bf16.vlgmr.msra.gmra.mxu2 %v212_v30 }
 0x124   :  { %v209_v31 = vpop.f32.mrf.mxu1 }
 0x1a6   :  { %v290_v33 = vpop.f32.mrf.mxu2 }
 0x1a7   :  { %v291_v34 = vadd.f32 %v414_v32, %v290_v33 }
 0x1a9   :  { %294 = vst [vmem:[#allocation10] sm:$0xff] %v291_v34 }
 0x1aa   :  { %305 = dma.vmem_to_hbm [thread:$0]  %s301_s25, 128, %s303_s28, [#allocation4]  }
 0x1ae   :  { %v292_v35 = vpop.f32.mrf.mxu2 }
 0x1af   :  { %541 = dma.done.wait [#allocation4], 128  }
 0x1b0   :  { %542 = vsyncadd [#allocation4], 4294967168 }
 0x1b1   :  { %310 = vsyncpa [#allocation3], 1 }
 0x1b2   :  { %311 = vsyncpa [#allocation6], 1 }
 0x1b3   :  { %312 = vsyncpa [#allocation9], 1 }
 0x1b4   :  { %313 = vsyncpa [#allocation4], 1 }

</bundles_post_ra>
